<compile_context>
chip_gen: v7x
topology: tpu7x:2x2x1
jax: 0.10.0
libtpu: 0.0.40
codegen_flags: <defaults>
</compile_context>

<pallas_src>
import functools

import jax
import jax.numpy as jnp
from jax.experimental import pallas as pl
from jax.experimental.pallas import tpu as pltpu

FLOAT32_TINY = jnp.finfo(jnp.float32).tiny  # == torch.finfo().tiny (default f32)


def irm_kernel(xthr_ref, ythr_ref, slope_ref, dinv_ref, a_ref, ht_ref, o_ref,
               *, num_knots):
    # a_ref   : [TM, N] int8 0/1 adjacency row tile (streamed, double-buffered, 1 B/elem)
    # ht_ref  : [C, N]  bf16 classifier output, column-normalized, transposed (lane-dense)
    # dinv_ref: [TM, 1] f32 row-side D^-1/2 scale
    # int8 is only the stream format; the MXU sees bf16 (works on v7x too).
    a_bf16 = a_ref[...].astype(jnp.float32).astype(jnp.bfloat16)

    # [TM, N] x [C, N] contracted over N (q @ k.T orientation) -> [TM, C] f32 on the MXU.
    logits = jax.lax.dot_general(
        a_bf16, ht_ref[...],
        dimension_numbers=(((1,), (1,)), ((), ())),
        preferred_element_type=jnp.float32)
    logits = dinv_ref[...] * logits                      # row-side D^-1/2

    # ---- softmax over the last dim (exp + approx reciprocal live on the EUP slot) ----
    m = jnp.max(logits, axis=-1, keepdims=True)
    e = jnp.exp(logits - m)
    probs = e * pl.reciprocal(jnp.sum(e, axis=-1, keepdims=True), approx=True)

    # ---- isotonic regression predict (clip OOB, piecewise-linear, precomputed slopes) ----
    x_lo = xthr_ref[0]
    x_hi = xthr_ref[num_knots - 1]
    p = jnp.clip(probs, x_lo, x_hi)

    y = jnp.full_like(p, ythr_ref[0])
    for k in range(num_knots - 1):           # K is small: static unroll, pure VPU filler
        xl = xthr_ref[k]
        # knots are monotone: the last segment whose left knot is <= p wins, identical
        # to the original two-sided (xl <= p <= xr) test after clipping.
        y = jnp.where(p >= xl, ythr_ref[k] + (p - xl) * slope_ref[k], y)

    p_calib = y + 1e-9 * probs
    o_ref[...] = jnp.log(p_calib + FLOAT32_TINY)


def _vmem_capacity_bytes():
    """Generation-aware VMEM size (v5e/v6e: 128 MiB, v7x: 64 MiB per TensorCore)."""
    try:
        return int(pltpu.get_tpu_info().vmem_capacity_bytes)
    except Exception:
        return 64 * 1024 * 1024  # conservative fallback (v7x per-core size)


def _pick_row_tile(n_rows, n_cols, vmem_cap):
    """Row tile for the int8 adjacency stream: multiple of 32 (int8 sublane pack),
    <= 512, sized so the double-buffered tile (+ small dinv/out/h blocks) fits a
    generation-aware VMEM budget; guarantees >= 2 grid steps when the row count
    allows so the 'parallel' axis can be sharded across both v7x TensorCores."""
    lane_cols = ((n_cols + 127) // 128) * 128            # int8 lane padding of one A row
    usable = max(8 * 1024 * 1024, int(vmem_cap * 0.70))
    fixed = 2 * 16 * lane_cols * 2 + (2 << 20)           # resident h_t buffers + headroom
    per_row = lane_cols + 2 * 128 * 4                    # A row + dinv row + out row (padded)
    per_buf = max(64 * 1024, (usable - fixed) // 2)      # one of the two A stream buffers
    tm = min(512, max(32, per_buf // per_row))
    tm = (tm // 32) * 32

    n32 = ((n_rows + 31) // 32) * 32                     # pad rows to the int8 sublane pack
    tm = min(tm, n32)
    if n32 >= 64 and tm > n32 // 2:                      # leave work for a 2nd TensorCore
        tm = max(32, ((n32 // 2) // 32) * 32)
    n_pad = pl.cdiv(n32, tm) * tm
    return tm, n_pad


def irm_forward(x, edge_index, w, x_thr, y_thr):
    """x: [N, F] f32, edge_index: [2, E] i32, w: [F, C] f32,
    x_thr/y_thr: [K] f32 monotone isotonic knots. Returns [N, C] f32 log-probs."""
    N = x.shape[0]
    C = w.shape[1]
    K = x_thr.shape[0]

    vmem_cap = _vmem_capacity_bytes()
    tm, n_pad = _pick_row_tile(N, N, vmem_cap)
    lane_cols = ((N + 127) // 128) * 128

    # --- glue: raw 0/1 (+self-loop) adjacency built directly at the padded row count,
    #     streamed as int8; the D^-1/2 normalization is factored out of the stream. ---
    src, dst = edge_index[0], edge_index[1]
    a = jnp.zeros((n_pad, N), jnp.int8)
    a = a.at[src, dst].set(1)
    a = a.at[dst, src].set(1)
    a = a + jnp.eye(n_pad, N, dtype=jnp.int8)            # self loops (padded rows stay 0)

    deg = jnp.sum(a, axis=-1, dtype=jnp.float32)         # [n_pad]
    dinv = jnp.where(deg > 0.0, jax.lax.rsqrt(jnp.maximum(deg, 1.0)), 0.0)
    dinv_rows = dinv.reshape(n_pad, 1)                   # row-side D^-1/2 (f32)

    # Column-side D^-1/2 folded into the tiny classifier output; transposed to (C, N)
    # so its resident VMEM block is lane-dense (no 4->128 lane padding per buffer).
    h_t = ((x @ w) * dinv[:N, None]).T.astype(jnp.bfloat16)   # [C, N] bf16

    # Precomputed per-knot slopes (no per-element divide, 0/0 guarded for dup knots).
    dx = x_thr[1:] - x_thr[:-1]
    dy = y_thr[1:] - y_thr[:-1]
    slope = jnp.where(dx > 0, dy / jnp.where(dx > 0, dx, 1.0), 0.0).astype(jnp.float32)
    if K < 2:
        slope = jnp.zeros((1,), jnp.float32)             # avoid a zero-length SMEM operand

    kernel = functools.partial(irm_kernel, num_knots=K)

    vmem_need = (2 * tm * lane_cols                       # int8 A double buffer
                 + 2 * 16 * lane_cols * 2                 # (C,N) bf16 h_t, double buffered
                 + 2 * tm * 128 * 4                       # dinv (tm,1) f32, lane padded
                 + 2 * tm * 128 * 4                       # out (tm,C) f32, lane padded
                 + (2 << 20))                             # compiler-scratch headroom
    vmem_limit = int(min(max(vmem_need, 32 * 1024 * 1024), int(vmem_cap * 0.75)))

    cost = pl.CostEstimate(
        flops=2 * n_pad * N * C,
        transcendentals=n_pad * C,                        # softmax exps
        bytes_accessed=n_pad * N + C * N * 2 + n_pad * 4 + n_pad * C * 4,
    )

    out_pad = pl.pallas_call(
        kernel,
        out_shape=jax.ShapeDtypeStruct((n_pad, C), jnp.float32),
        grid=(n_pad // tm,),
        in_specs=[
            pl.BlockSpec(memory_space=pltpu.MemorySpace.SMEM),   # x_thr (scalar knots)
            pl.BlockSpec(memory_space=pltpu.MemorySpace.SMEM),   # y_thr (scalar knots)
            pl.BlockSpec(memory_space=pltpu.MemorySpace.SMEM),   # precomputed slopes
            pl.BlockSpec((tm, 1), lambda i: (i, 0)),             # row-side D^-1/2 (f32)
            pl.BlockSpec((tm, N), lambda i: (i, 0)),             # raw adjacency tile (int8)
            pl.BlockSpec((C, N), lambda i: (0, 0)),              # h_t, resident (bf16)
        ],
        out_specs=pl.BlockSpec((tm, C), lambda i: (i, 0)),
        compiler_params=pltpu.CompilerParams(
            dimension_semantics=("parallel",),    # v7x: shard row tiles across both TCs
            vmem_limit_bytes=vmem_limit,          # generation-aware, 75% cap for headroom
        ),
        cost_estimate=cost,
    )(x_thr, y_thr, slope, dinv_rows, a, h_t)

    return out_pad[:N]


if __name__ == "__main__":
    N, F, C, E, K = 128, 32, 4, 256, 8

    key = jax.random.PRNGKey(0)
    kx, kw, ke = jax.random.split(key, 3)

    # deterministic example inputs / parameters
    x = jax.random.normal(kx, (N, F), dtype=jnp.float32)
    w = (jax.random.normal(kw, (F, C)) * 0.1).astype(jnp.float32)
    edge_index = jax.random.randint(ke, (2, E), 0, N, dtype=jnp.int32)

    # deterministic monotone isotonic-regression knots (as fit would produce)
    x_thr = jnp.linspace(0.0, 1.0, K, dtype=jnp.float32)
    y_thr = jnp.asarray(jnp.linspace(0.0, 1.0, K) ** 1.5, dtype=jnp.float32)

    out = irm_forward(x, edge_index, w, x_thr, y_thr)
    out = jax.block_until_ready(out)

    assert out.shape == (N, C)
    assert bool(jnp.all(jnp.isfinite(out)))
    print("KERNEL_OK")
</pallas_src>

<mosaic_0001>
module attributes {stable_mosaic.version = 11 : i64} {
  func.func @irm_kernel(%arg0: i32, %arg1: memref<8xf32, #tpu.memory_space<smem>>, %arg2: memref<8xf32, #tpu.memory_space<smem>>, %arg3: memref<7xf32, #tpu.memory_space<smem>>, %arg4: memref<64x1xf32, #tpu.memory_space<vmem>>, %arg5: memref<64x128xi8, #tpu.memory_space<vmem>>, %arg6: memref<4x128xbf16, #tpu.memory_space<vmem>>, %arg7: memref<64x4xf32, #tpu.memory_space<vmem>>) attributes {dimension_semantics = [#tpu.dimension_semantics<parallel>], iteration_bounds = array<i64: 2>, scalar_prefetch = 0 : i64, scratch_operands = 0 : i64, tpu.core_type = #tpu.core_type<tc>, window_params = [{transform_indices = @transform_0, window_bounds = array<i64: 8>}, {transform_indices = @transform_1, window_bounds = array<i64: 8>}, {transform_indices = @transform_2, window_bounds = array<i64: 7>}, {transform_indices = @transform_3, window_bounds = array<i64: 64, 1>}, {transform_indices = @transform_4, window_bounds = array<i64: 64, 128>}, {pipeline_mode = #tpu.pipeline_mode<synchronous>, transform_indices = @transform_5, window_bounds = array<i64: 4, 128>}, {transform_indices = @transform_6, window_bounds = array<i64: 64, 4>}]} {
    %c0 = arith.constant 0 : index
    %c0_0 = arith.constant 0 : index
    %0 = vector.load %arg5[%c0, %c0_0] : memref<64x128xi8, #tpu.memory_space<vmem>>, vector<64x128xi8>
    %1 = arith.sitofp %0 : vector<64x128xi8> to vector<64x128xf32>
    %2 = arith.truncf %1 : vector<64x128xf32> to vector<64x128xbf16>
    %c0_1 = arith.constant 0 : index
    %c0_2 = arith.constant 0 : index
    %3 = vector.load %arg6[%c0_1, %c0_2] : memref<4x128xbf16, #tpu.memory_space<vmem>>, vector<4x128xbf16>
    %cst = arith.constant dense<0.000000e+00> : vector<64x4xf32>
    %4 = tpu.matmul %2, %3, %cst {dimension_numbers = #tpu.dot_dimension_numbers<[1], [1], [0], [0], [0, 0, 1, 0], [], []>} : vector<64x128xbf16>, vector<4x128xbf16>, vector<64x4xf32> -> vector<64x4xf32>
    %c0_3 = arith.constant 0 : index
    %c0_4 = arith.constant 0 : index
    %5 = vector.load %arg4[%c0_3, %c0_4] : memref<64x1xf32, #tpu.memory_space<vmem>>, vector<64x1xf32>
    %6 = vector.broadcast %5 : vector<64x1xf32> to vector<64x4xf32>
    %7 = arith.mulf %6, %4 : vector<64x4xf32>
    %cst_5 = arith.constant dense<0xFF800000> : vector<64xf32>
    %8 = vector.multi_reduction <maximumf>, %7, %cst_5 [1] : vector<64x4xf32> to vector<64xf32>
    %9 = vector.shape_cast %8 : vector<64xf32> to vector<64x1xf32>
    %10 = vector.broadcast %9 : vector<64x1xf32> to vector<64x4xf32>
    %11 = arith.subf %7, %10 : vector<64x4xf32>
    %12 = math.exp %11 : vector<64x4xf32>
    %cst_6 = arith.constant dense<0.000000e+00> : vector<64xf32>
    %13 = vector.multi_reduction <add>, %12, %cst_6 [1] : vector<64x4xf32> to vector<64xf32>
    %14 = vector.shape_cast %13 : vector<64xf32> to vector<64x1xf32>
    %15 = tpu.reciprocal %14 {approx = true} : vector<64x1xf32> -> vector<64x1xf32>
    %16 = vector.broadcast %15 : vector<64x1xf32> to vector<64x4xf32>
    %17 = arith.mulf %12, %16 : vector<64x4xf32>
    %c0_7 = arith.constant 0 : index
    %18 = memref.load %arg1[%c0_7] : memref<8xf32, #tpu.memory_space<smem>>
    %c7 = arith.constant 7 : index
    %19 = memref.load %arg1[%c7] : memref<8xf32, #tpu.memory_space<smem>>
    %20 = vector.broadcast %18 : f32 to vector<64x4xf32>
    %21 = arith.maximumf %20, %17 : vector<64x4xf32>
    %22 = vector.broadcast %19 : f32 to vector<64x4xf32>
    %23 = arith.minimumf %22, %21 : vector<64x4xf32>
    %c0_8 = arith.constant 0 : index
    %24 = memref.load %arg2[%c0_8] : memref<8xf32, #tpu.memory_space<smem>>
    %25 = vector.broadcast %24 : f32 to vector<64x4xf32>
    %c0_9 = arith.constant 0 : index
    %26 = memref.load %arg1[%c0_9] : memref<8xf32, #tpu.memory_space<smem>>
    %27 = vector.broadcast %26 : f32 to vector<64x4xf32>
    %28 = arith.cmpf oge, %23, %27 : vector<64x4xf32>
    %c0_10 = arith.constant 0 : index
    %29 = memref.load %arg2[%c0_10] : memref<8xf32, #tpu.memory_space<smem>>
    %30 = vector.broadcast %26 : f32 to vector<64x4xf32>
    %31 = arith.subf %23, %30 : vector<64x4xf32>
    %c0_11 = arith.constant 0 : index
    %32 = memref.load %arg3[%c0_11] : memref<7xf32, #tpu.memory_space<smem>>
    %33 = vector.broadcast %32 : f32 to vector<64x4xf32>
    %34 = arith.mulf %31, %33 : vector<64x4xf32>
    %35 = vector.broadcast %29 : f32 to vector<64x4xf32>
    %36 = arith.addf %35, %34 : vector<64x4xf32>
    %37 = arith.select %28, %36, %25 : vector<64x4xi1>, vector<64x4xf32>
    %c1 = arith.constant 1 : index
    %38 = memref.load %arg1[%c1] : memref<8xf32, #tpu.memory_space<smem>>
    %39 = vector.broadcast %38 : f32 to vector<64x4xf32>
    %40 = arith.cmpf oge, %23, %39 : vector<64x4xf32>
    %c1_12 = arith.constant 1 : index
    %41 = memref.load %arg2[%c1_12] : memref<8xf32, #tpu.memory_space<smem>>
    %42 = vector.broadcast %38 : f32 to vector<64x4xf32>
    %43 = arith.subf %23, %42 : vector<64x4xf32>
    %c1_13 = arith.constant 1 : index
    %44 = memref.load %arg3[%c1_13] : memref<7xf32, #tpu.memory_space<smem>>
    %45 = vector.broadcast %44 : f32 to vector<64x4xf32>
    %46 = arith.mulf %43, %45 : vector<64x4xf32>
    %47 = vector.broadcast %41 : f32 to vector<64x4xf32>
    %48 = arith.addf %47, %46 : vector<64x4xf32>
    %49 = arith.select %40, %48, %37 : vector<64x4xi1>, vector<64x4xf32>
    %c2 = arith.constant 2 : index
    %50 = memref.load %arg1[%c2] : memref<8xf32, #tpu.memory_space<smem>>
    %51 = vector.broadcast %50 : f32 to vector<64x4xf32>
    %52 = arith.cmpf oge, %23, %51 : vector<64x4xf32>
    %c2_14 = arith.constant 2 : index
    %53 = memref.load %arg2[%c2_14] : memref<8xf32, #tpu.memory_space<smem>>
    %54 = vector.broadcast %50 : f32 to vector<64x4xf32>
    %55 = arith.subf %23, %54 : vector<64x4xf32>
    %c2_15 = arith.constant 2 : index
    %56 = memref.load %arg3[%c2_15] : memref<7xf32, #tpu.memory_space<smem>>
    %57 = vector.broadcast %56 : f32 to vector<64x4xf32>
    %58 = arith.mulf %55, %57 : vector<64x4xf32>
    %59 = vector.broadcast %53 : f32 to vector<64x4xf32>
    %60 = arith.addf %59, %58 : vector<64x4xf32>
    %61 = arith.select %52, %60, %49 : vector<64x4xi1>, vector<64x4xf32>
    %c3 = arith.constant 3 : index
    %62 = memref.load %arg1[%c3] : memref<8xf32, #tpu.memory_space<smem>>
    %63 = vector.broadcast %62 : f32 to vector<64x4xf32>
    %64 = arith.cmpf oge, %23, %63 : vector<64x4xf32>
    %c3_16 = arith.constant 3 : index
    %65 = memref.load %arg2[%c3_16] : memref<8xf32, #tpu.memory_space<smem>>
    %66 = vector.broadcast %62 : f32 to vector<64x4xf32>
    %67 = arith.subf %23, %66 : vector<64x4xf32>
    %c3_17 = arith.constant 3 : index
    %68 = memref.load %arg3[%c3_17] : memref<7xf32, #tpu.memory_space<smem>>
    %69 = vector.broadcast %68 : f32 to vector<64x4xf32>
    %70 = arith.mulf %67, %69 : vector<64x4xf32>
    %71 = vector.broadcast %65 : f32 to vector<64x4xf32>
    %72 = arith.addf %71, %70 : vector<64x4xf32>
    %73 = arith.select %64, %72, %61 : vector<64x4xi1>, vector<64x4xf32>
    %c4 = arith.constant 4 : index
    %74 = memref.load %arg1[%c4] : memref<8xf32, #tpu.memory_space<smem>>
    %75 = vector.broadcast %74 : f32 to vector<64x4xf32>
    %76 = arith.cmpf oge, %23, %75 : vector<64x4xf32>
    %c4_18 = arith.constant 4 : index
    %77 = memref.load %arg2[%c4_18] : memref<8xf32, #tpu.memory_space<smem>>
    %78 = vector.broadcast %74 : f32 to vector<64x4xf32>
    %79 = arith.subf %23, %78 : vector<64x4xf32>
    %c4_19 = arith.constant 4 : index
    %80 = memref.load %arg3[%c4_19] : memref<7xf32, #tpu.memory_space<smem>>
    %81 = vector.broadcast %80 : f32 to vector<64x4xf32>
    %82 = arith.mulf %79, %81 : vector<64x4xf32>
    %83 = vector.broadcast %77 : f32 to vector<64x4xf32>
    %84 = arith.addf %83, %82 : vector<64x4xf32>
    %85 = arith.select %76, %84, %73 : vector<64x4xi1>, vector<64x4xf32>
    %c5 = arith.constant 5 : index
    %86 = memref.load %arg1[%c5] : memref<8xf32, #tpu.memory_space<smem>>
    %87 = vector.broadcast %86 : f32 to vector<64x4xf32>
    %88 = arith.cmpf oge, %23, %87 : vector<64x4xf32>
    %c5_20 = arith.constant 5 : index
    %89 = memref.load %arg2[%c5_20] : memref<8xf32, #tpu.memory_space<smem>>
    %90 = vector.broadcast %86 : f32 to vector<64x4xf32>
    %91 = arith.subf %23, %90 : vector<64x4xf32>
    %c5_21 = arith.constant 5 : index
    %92 = memref.load %arg3[%c5_21] : memref<7xf32, #tpu.memory_space<smem>>
    %93 = vector.broadcast %92 : f32 to vector<64x4xf32>
    %94 = arith.mulf %91, %93 : vector<64x4xf32>
    %95 = vector.broadcast %89 : f32 to vector<64x4xf32>
    %96 = arith.addf %95, %94 : vector<64x4xf32>
    %97 = arith.select %88, %96, %85 : vector<64x4xi1>, vector<64x4xf32>
    %c6 = arith.constant 6 : index
    %98 = memref.load %arg1[%c6] : memref<8xf32, #tpu.memory_space<smem>>
    %99 = vector.broadcast %98 : f32 to vector<64x4xf32>
    %100 = arith.cmpf oge, %23, %99 : vector<64x4xf32>
    %c6_22 = arith.constant 6 : index
    %101 = memref.load %arg2[%c6_22] : memref<8xf32, #tpu.memory_space<smem>>
    %102 = vector.broadcast %98 : f32 to vector<64x4xf32>
    %103 = arith.subf %23, %102 : vector<64x4xf32>
    %c6_23 = arith.constant 6 : index
    %104 = memref.load %arg3[%c6_23] : memref<7xf32, #tpu.memory_space<smem>>
    %105 = vector.broadcast %104 : f32 to vector<64x4xf32>
    %106 = arith.mulf %103, %105 : vector<64x4xf32>
    %107 = vector.broadcast %101 : f32 to vector<64x4xf32>
    %108 = arith.addf %107, %106 : vector<64x4xf32>
    %109 = arith.select %100, %108, %97 : vector<64x4xi1>, vector<64x4xf32>
    %cst_24 = arith.constant 9.99999971E-10 : f32
    %110 = vector.broadcast %cst_24 : f32 to vector<64x4xf32>
    %111 = arith.mulf %110, %17 : vector<64x4xf32>
    %112 = arith.addf %109, %111 : vector<64x4xf32>
    %cst_25 = arith.constant 1.17549435E-38 : f32
    %113 = vector.broadcast %cst_25 : f32 to vector<64x4xf32>
    %114 = arith.addf %112, %113 : vector<64x4xf32>
    %115 = math.log %114 : vector<64x4xf32>
    %c0_26 = arith.constant 0 : index
    %c0_27 = arith.constant 0 : index
    %116 = vector.load %arg7[%c0_26, %c0_27] : memref<64x4xf32, #tpu.memory_space<vmem>>, vector<64x4xf32>
    tpu.vector_store %arg7[%c0_26, %c0_27], %115 {strides = array<i32>} : memref<64x4xf32, #tpu.memory_space<vmem>>, vector<64x4xf32>,
    return
  }
  func.func @transform_0(%arg0: i32) -> i32 {
    %c0_i32 = arith.constant 0 : i32
    %c0_i32_0 = arith.constant 0 : i32
    return %c0_i32 : i32
  }
  func.func @transform_1(%arg0: i32) -> i32 {
    %c0_i32 = arith.constant 0 : i32
    %c0_i32_0 = arith.constant 0 : i32
    return %c0_i32 : i32
  }
  func.func @transform_2(%arg0: i32) -> i32 {
    %c0_i32 = arith.constant 0 : i32
    %c0_i32_0 = arith.constant 0 : i32
    return %c0_i32 : i32
  }
  func.func @transform_3(%arg0: i32) -> (i32, i32) {
    %c0_i32 = arith.constant 0 : i32
    %c0_i32_0 = arith.constant 0 : i32
    return %arg0, %c0_i32 : i32, i32
  }
  func.func @transform_4(%arg0: i32) -> (i32, i32) {
    %c0_i32 = arith.constant 0 : i32
    %c0_i32_0 = arith.constant 0 : i32
    return %arg0, %c0_i32 : i32, i32
  }
  func.func @transform_5(%arg0: i32) -> (i32, i32) {
    %c0_i32 = arith.constant 0 : i32
    %c0_i32_0 = arith.constant 0 : i32
    %c0_i32_1 = arith.constant 0 : i32
    return %c0_i32, %c0_i32_0 : i32, i32
  }
  func.func @transform_6(%arg0: i32) -> (i32, i32) {
    %c0_i32 = arith.constant 0 : i32
    %c0_i32_0 = arith.constant 0 : i32
    return %arg0, %c0_i32 : i32, i32
  }
}

</mosaic_0001>

<bundles_post_ra>
// kernel: tpu_custom_call.1
= control target key start
LH: loop header
LB: loop body
LE: loop exit
PB: predicated region body
PF: predicated region fallthrough
CT: control target
= control target key end

     0   :  { %11 = vsyncpa [#allocation3], 0  ;;  %s1848_s0 = inlined_call_operand.vmem [shape: f32[8], index: 0, kind: input, shape index: {}]   ;;  %s1849_s1 = inlined_call_operand.vmem [shape: f32[8], index: 1, kind: input, shape index: {}]   ;;  %s1850_s2 = inlined_call_operand.vmem [shape: f32[7], index: 2, kind: input, shape index: {}]   ;;  %s1851_s3 = inlined_call_operand.vmem [shape: f32[128,1], index: 3, kind: input, shape index: {}]   ;;  %s1852_s4 = inlined_call_operand.vmem [shape: s8[128,128], index: 4, kind: input, shape index: {}]   ;;  %s1853_s5 = inlined_call_operand.vmem [shape: bf16[4,128], index: 5, kind: input, shape index: {}]   ;;  %s1854_s6 = inlined_call_operand.vmem [shape: f32[128,4], index: 6, kind: output, shape index: {}]  }
   0x1   :  { %12 = vsyncpa [#allocation5], 0  ;;  %s1266_s21 = smov 0  }
   0x2 LB: > { %s1272_s22 = sadd.s32 4294967295, %s1225_s21   ;;  %p1023_p0 = scmp.ge.s32.totalorder %s1225_s21, 1  ;;  %s1225_s21 = sphi %s1266_s21, %s18_s21  }
   0x3   : > { %p185_p1 = scmp.lt.s32.totalorder %s1225_s21, 3  ;;  %s209_s25 = sshll.u32 %s1849_s1, 4  ;;  %s210_s25 = int_to_ptr.vmem [resolvable:$true] %s209_s25 }
   0x4   : > { %p1855_p3 = scmp.eq.s32.totalorder %s1272_s22, 0  ;;  %s198_s29 = sshll.u32 %s1848_s0, 4  ;;  %s199_s29 = int_to_ptr.vmem [resolvable:$true] %s198_s29 }
   0x5   : > { %p1279_p2 = pnand %p1023_p0, %p185_p1  ;;  %s220_s8 = sshll.u32 %s1850_s2, 4  ;;  %s1298_s8 = int_to_ptr.vmem [resolvable:$true] %s220_s8 }
   0x6   : > { %s1166_s10 = scalar_lea.vmem %s210_s25, 16  ;;  %p1174_p10 = scmp.lt.s32.totalorder %s210_s25, %s210_s25 }
   0x7   : > { %s1858_s26 = scalar_select %p1279_p2, 1, 0 }
   0x8   : > { %p1088_p4 = pneg %p1279_p2  ;;  %p1167_p6 = scmp.ne.s32.totalorder %s210_s25, %s1166_s10 }
   0x9   : > { %p1175_p11 = scmp.lt.s32.totalorder %s1166_s10, %s1166_s10 }
   0xa   : > { %p1294_p5 = pnand %p1855_p3, %p1088_p4 }
   0xb   : > { %p1176_p12 = por %p1175_p11, %p1174_p10 }
   0xc   : > { %p1168_p7 = pneg %p1294_p5 }
   0xe   : > { %p1169_p8 = pnand %p1168_p7, %p1167_p6 }
  0x10   : > { %p1170_p9 = pneg %p1169_p8 }
  0x12   : > { %p1177_p13 = pnand %p1176_p12, %p1170_p9 }
  0x14   : > { %1180 = shalt.err (!%p1177_p13)
}
  0x15   : > { %s1227_s11 = smov [#allocation4]   ;;  %s1181_s12 = scalar_lea.vmem %s199_s29, 16 }
  0x16   : > { %1094 = dma.vmem_to_smem (!%p1294_p5), %s210_s25, 16, %s1227_s11, [#allocation5]  }
  0x17   : > { %p1182_p0 = scmp.ne.s32.totalorder %s199_s29, %s1181_s12  ;;  %p1189_p3 = scmp.lt.s32.totalorder %s199_s29, %s199_s29 }
  0x18   : > { %p1190_p2 = scmp.lt.s32.totalorder %s1181_s12, %s1181_s12 }
  0x19   : > { %p1184_p1 = pnand %p1182_p0, %p1168_p7 }
  0x1a   : > { %p1191_p6 = por %p1190_p2, %p1189_p3 }
  0x1b   : > { %p1185_p4 = pneg %p1184_p1 }
  0x1d   : > { %p1192_p8 = pnand %p1191_p6, %p1185_p4 }
  0x1f   : > { %1195 = shalt.err (!%p1192_p8)
}
  0x20   : > { %s1228_s13 = smov [#allocation2]   ;;  %s1196_s14 = scalar_lea.vmem %s1298_s8, 16 }
  0x21   : > { %1091 = dma.vmem_to_smem (!%p1294_p5), %s199_s29, 16, %s1228_s13, [#allocation3]  }
  0x22   : > { %p1197_p9 = scmp.ne.s32.totalorder %s1298_s8, %s1196_s14  ;;  %p1204_p12 = scmp.lt.s32.totalorder %s1298_s8, %s1298_s8 }
  0x23   : > { %p1205_p13 = scmp.lt.s32.totalorder %s1196_s14, %s1196_s14 }
  0x24   : > { %p1199_p10 = pnand %p1197_p9, %p1168_p7 }
  0x25   : > { %p1206_p2 = por %p1205_p13, %p1204_p12 }
  0x26   : > { %p1200_p11 = pneg %p1199_p10 }
  0x28   : > { %p1207_p3 = pnand %p1206_p2, %p1200_p11 }
  0x2a   : > { %1210 = shalt.err (!%p1207_p3)
}
  0x2b   : > { %s1229_s15 = smov [#allocation6]   ;;  %p1860_p0 = scmp.ne.s32.totalorder %s1858_s26, 0 }
  0x2c   : > { %1097 = dma.vmem_to_smem (!%p1294_p5), %s1298_s8, 16, %s1229_s15, [#allocation5]  }
  0x2d   : > { %254 = sbr.rel (%p1860_p0) target bundleno = 710 (0x2c6), region = 44  ;;  %p1861_p1 = scmp.eq.s32.totalorder (!%p1860_p0), %s1272_s22, 0 }
  0x34   : > { %1216 = dma.done.wait (%p1861_p1), [#allocation3], 16   ;;  %p1862_p7 = pmov %p1861_p1 }
  0x35   : > { %p1863_p4 = pmov %p1861_p1 }
  0x36   : > { %1218 = vsyncadd (%p1862_p7), [#allocation3], 4294967280 }
  0x37   : > { %1220 = dma.done.wait (%p1863_p4), [#allocation5], 32   ;;  %p1864_p6 = pmov %p1861_p1 }
  0x39   : > { %1222 = vsyncadd (%p1864_p6), [#allocation5], 4294967264 }
  0x3a   : > { %268 = sfence }
  0x3b   : > { %v323_v0 = vld [vmem:[%s1853_s5] sm:$0x3]  ;;  %s1034_s18 = sshll.u32 %s1272_s22, 1  ;;  %s1032_s19 = sshll.u32 %s1272_s22, 3  ;;  %v1230_v1 = vmov 0   ;;  %vm445_vm0 = vcmask 31744  }
  0x3c   : > { %1064 = vmatprep.subr.bf16.mxu0 %v323_v0  ;;  %1074 = vmatprep.subr.bf16.mxu1 %v323_v0  ;;  %p305_p5 = scmp.lt.s32.totalorder %s1034_s18, 3  ;;  %p299_p8 = scmp.lt.s32.totalorder %s1032_s19, 15 }
  0x3d   : > { %1065 = vmatpush3.bf16.xpose.msra.mxu0 %v323_v0  ;;  %1075 = vmatpush3.bf16.xpose.msra.mxu1 %v323_v0  ;;  %s534_s29 = sld [smem:[#allocation2]]  ;;  %s1038_s30 = sld [smem:[#allocation2 + $0x7]] }
  0x3e   : > { %s1867_s18 = smov (!%p305_p5, %s1034_s18), 3  ;;  %1117 = vset.pattern.permute.xlu1 %v1230_v1  ;;  %1116 = vset.pattern.permute.xlu0 %v1230_v1  ;;  %s1869_s19 = smov (!%p299_p8, %s1032_s19), 15 }
  0x3f   : > { %s1035_s20 = sshll.u32 %s1867_s18, 3  ;;  %s1857_s22 = sshll.u32 %s1869_s19, 3 }
  0x40   : > { %s308_s25 = scalar_lea.vmem %s1852_s4, %s1035_s20  ;;  %s302_s28 = scalar_lea.vmem %s1851_s3, %s1857_s22 }
  0x41   : > { %v317_v2 = vld [vmem:[%s308_s25] sm:$0xff]  ;;  %v318_v3 = vld [vmem:[%s308_s25 + $0x8] sm:$0xff]  ;;  %v391_v8 = vld [vmem:[%s302_s28 + $0x10] sm:$0xff]  ;;  %s554_s7 = sld [smem:[#allocation4]]  ;;  %s1039_s9 = sld [smem:[#allocation2 + $0x1]] }
  0x42   : > { %v319_v4 = vunpack.c.l.s8.bf16 %v317_v2  ;;  %v320_v5 = vunpack.c.h.s8.bf16 %v317_v2  ;;  %v321_v6 = vunpack.c.l.s8.bf16 %v318_v3  ;;  %v322_v7 = vunpack.c.h.s8.bf16 %v318_v3  ;;  %v389_v9 = vld [vmem:[%s302_s28] sm:$0xff]  ;;  %409 = vperm.xlu1 %1117, %v391_v8   ;;  %v392_v10 = vld [vmem:[%s302_s28 + $0x18] sm:$0xff]  ;;  %v390_v11 = vld [vmem:[%s302_s28 + $0x8] sm:$0xff]  ;;  %s572_s8 = sld [smem:[#allocation6]]  ;;  %s1040_s10 = sld [smem:[#allocation4 + $0x1]] }
  0x43   : > { %399 = vperm.xlu0 %1116, %v389_v9   ;;  %v394_v12 = vld [vmem:[%s302_s28 + $0x28] sm:$0xff]  ;;  %v393_v13 = vld [vmem:[%s302_s28 + $0x20] sm:$0xff]  ;;  %v396_v14 = vld [vmem:[%s302_s28 + $0x38] sm:$0xff]  ;;  %s1388_s11 = sld [smem:[#allocation6 + $0x1]]  ;;  %s1390_s12 = sld [smem:[#allocation2 + $0x2]] }
  0x44   : > { %1066 = vmatprep.mubr.bf16.mxu0 %v319_v4  ;;  %1070 = vmatprep.mubr.bf16.mxu1 %v321_v6  ;;  %v395_v15 = vld [vmem:[%s302_s28 + $0x30] sm:$0xff]  ;;  %s1392_s13 = sld [smem:[#allocation4 + $0x2]]  ;;  %s1396_s15 = sld [smem:[#allocation2 + $0x3]] }
  0x45   : > { %1067 = vmatmul.mubr.bf16.vlgmr.msra.gmra.mrb[0].mxu0 %v320_v5  ;;  %1071 = vmatmul.mubr.bf16.vlgmr.msra.gmra.mrb[0].mxu1 %v322_v7  ;;  %s1394_s14 = sld [smem:[#allocation6 + $0x2]]  ;;  %s1398_s16 = sld [smem:[#allocation4 + $0x3]] }
  0x46   : > { %414 = vperm.xlu1 %1117, %v392_v10   ;;  %s1400_s17 = sld [smem:[#allocation6 + $0x3]]  ;;  %s1402_s18 = sld [smem:[#allocation2 + $0x4]] }
  0x47   : > { %404 = vperm.xlu0 %1116, %v390_v11   ;;  %s1404_s20 = sld [smem:[#allocation4 + $0x4]]  ;;  %s1408_s24 = sld [smem:[#allocation2 + $0x5]] }
  0x48   : > { %s1406_s23 = sld [smem:[#allocation6 + $0x4]]  ;;  %s1410_s25 = sld [smem:[#allocation4 + $0x5]] }
  0x49   : > { %s1412_s26 = sld [smem:[#allocation6 + $0x5]]  ;;  %s1414_s27 = sld [smem:[#allocation2 + $0x6]] }
  0x4a   : > { %424 = vperm.xlu1 %1117, %v394_v12   ;;  %s1416_s28 = sld [smem:[#allocation4 + $0x6]] }
  0x4b   : > { %419 = vperm.xlu0 %1116, %v393_v13   ;;  %s1418_s22 = sld [smem:[#allocation6 + $0x6]] }
  0x4e   : > { %434 = vperm.xlu1 %1117, %v396_v14  }
  0x4f   : > { %429 = vperm.xlu0 %1116, %v395_v15  }
  0xc1   : > { %v410_v17 = vpop.permute.xlu1 %409 }
  0xc2   : > { %v400_v16 = vpop.permute.xlu0 %399 }
  0xc5   : > { %v415_v19 = vpop.permute.xlu1 %414 }
  0xc6   : > { %v405_v18 = vpop.permute.xlu0 %404 }
  0xc9   : > { %v425_v38 = vpop.permute.xlu1 %424 }
  0xca   : > { %v420_v20 = vpop.permute.xlu0 %419 }
  0xcd   : > { %v435_v44 = vpop.permute.xlu1 %434 }
  0xce   : > { %v430_v35 = vpop.permute.xlu0 %429 }
 0x118   : > { %v1068_v21 = vpop.f32.mrb[0].mxu0  ;;  %v1072_v22 = vpop.f32.mrb[0].mxu1 }
 0x119   : > { %v439_v23 = vmul.f32 %v1068_v21, %v410_v17  ;;  %v358_v24 = vpop.f32.mrb[1].mxu0  ;;  %v374_v25 = vpop.f32.mrb[1].mxu1  ;;  %v443_v39 = vmul.f32 %v1072_v22, %v430_v35 }
 0x11a   : > { %v441_v26 = vmul.f32 %v420_v20, %v374_v25  ;;  %v1069_v27 = vpop.f32.mrb[2].mxu0  ;;  %v1073_v28 = vpop.f32.mrb[2].mxu1  ;;  %v437_v29 = vmul.f32 %v400_v16, %v358_v24 }
 0x11b   : > { %v361_v30 = vpop.f32.mrb[3].mxu0  ;;  %v377_v31 = vpop.f32.mrb[3].mxu1  ;;  %v452_v32 = vsel %vm445_vm0, %v439_v23, -inf  ;;  %v440_v36 = vmul.f32 %v1069_v27, %v415_v19  ;;  %v464_v43 = vsel %vm445_vm0, %v443_v39, -inf  ;;  %v444_v45 = vmul.f32 %v1073_v28, %v435_v44 }
 0x11c   : > { %v438_v33 = vmul.f32 %v405_v18, %v361_v30  ;;  %453 = vmax.xlane.f32.xlu0 %v452_v32  ;;  %v458_v34 = vsel %vm445_vm0, %v441_v26, -inf  ;;  %v446_v37 = vsel %vm445_vm0, %v437_v29, -inf  ;;  %v442_v41 = vmul.f32 %v425_v38, %v377_v31 }
 0x11d   : > { %459 = vmax.xlane.f32.xlu1 %v458_v34  ;;  %v455_v42 = vsel %vm445_vm0, %v440_v36, -inf  ;;  %v467_v47 = vsel %vm445_vm0, %v444_v45, -inf  ;;  %v1422_v30 = vstv %s1038_s30  ;;  %v1424_v31 = vstv %s554_s7 }
 0x11e   : > { %v449_v40 = vsel %vm445_vm0, %v438_v33, -inf  ;;  %v461_v46 = vsel %vm445_vm0, %v442_v41, -inf  ;;  %v1426_v32 = vstv %s572_s8  ;;  %v1430_v34 = vstv %s1040_s10 }
 0x11f   : > { %v1434_v38 = vstv %s1388_s11 }
 0x120   : > { %447 = vmax.xlane.f32.xlu0 %v446_v37 }
 0x121   : > { %450 = vmax.xlane.f32.xlu1 %v449_v40  ;;  %v1440_v40 = vstv %s1394_s14 }
 0x124   : > { %456 = vmax.xlane.f32.xlu0 %v455_v42  ;;  %v1446_v42 = vstv %s1396_s15 }
 0x125   : > { %465 = vmax.xlane.f32.xlu1 %v464_v43  ;;  %v1449_v43 = vstv %s1398_s16 }
 0x128   : > { %462 = vmax.xlane.f32.xlu0 %v461_v46  ;;  %v1456_v46 = vstv %s1402_s18 }
 0x12c   : > { %468 = vmax.xlane.f32.xlu0 %v467_v47  ;;  %v1459_v47 = vstv %s1406_s23 }
 0x1a9   : > { %v454_v48 = vpop.xlane.xlu0 %453 }
 0x1aa   : > { %v472_v49 = vsub.f32 %v439_v23, %v454_v48  ;;  %v460_v50 = vpop.xlane.xlu1 %459 }
 0x1ab   : > { %v474_v52 = vsub.f32 %v441_v26, %v460_v50  ;;  %v1465_v50 = vstv %s1408_s24 }
 0x1ac   : > { %v482_v51 = vmul.f32 1.442695, %v472_v49  ;;  %v1462_v49 = vstv %s1404_s20 }
 0x1ad   : > { %v448_v53 = vpop.xlane.xlu0 %447  ;;  %v486_v57 = vmul.f32 1.442695, %v474_v52 }
 0x1ae   : > { %1118 = vpow2.f32 %v482_v51  ;;  %v470_v54 = vsub.f32 %v437_v29, %v448_v53  ;;  %v451_v55 = vpop.xlane.xlu1 %450  ;;  %v1420_v29 = vstv %s534_s29  ;;  %v1468_v51 = vstv %s1410_s25 }
 0x1af   : > { %v471_v56 = vsub.f32 %v438_v33, %v451_v55  ;;  %v1428_v33 = vstv %s1039_s9  ;;  %v1475_v55 = vstv %s1414_s27 }
 0x1b0   : > { %v478_v58 = vmul.f32 1.442695, %v470_v54  ;;  %v1472_v54 = vstv %s1412_s26 }
 0x1b1   : > { %v457_v59 = vpop.xlane.xlu0 %456  ;;  %v480_v62 = vmul.f32 1.442695, %v471_v56  ;;  %v1478_v56 = vstv %s1418_s22  ;;  %s1865_s22 = sshll.u32 %s1869_s19, 3 }
 0x1b2   : > { %1120 = vpow2.f32 %v478_v58  ;;  %v473_v60 = vsub.f32 %v440_v36, %v457_v59  ;;  %v466_v61 = vpop.xlane.xlu1 %465  ;;  %s1614_s7 = scalar_lea.vmem %s1854_s6, %s1865_s22 }
 0x1b3   : > { %v476_v63 = vsub.f32 %v443_v39, %v466_v61  ;;  %1122 = vpow2.f32 %v486_v57  ;;  %v1437_v39 = vstv %s1390_s12  ;;  %v1481_v57 = vstv %s1416_s28 }
 0x1b4   : > { %v484_v0 = vmul.f32 1.442695, %v473_v60 }
 0x1b5   : > { %v490_v1 = vmul.f32 1.442695, %v476_v63  ;;  %v463_v2 = vpop.xlane.xlu0 %462 }
 0x1b6   : > { %1124 = vpow2.f32 %v484_v0  ;;  %v475_v3 = vsub.f32 %v442_v41, %v463_v2  ;;  %v1443_v41 = vstv %s1392_s13 }
 0x1b7   : > { %1126 = vpow2.f32 %v480_v62 }
 0x1b8   : > { %v1356_v4 = vpop.eup %1118  ;;  %1128 = vpow2.f32 %v490_v1  ;;  %v488_v5 = vmul.f32 1.442695, %v475_v3 }
 0x1b9   : > { %v469_v6 = vpop.xlane.xlu0 %468  ;;  %v500_v7 = vsel %vm445_vm0, %v1356_v4, 0.0 }
 0x1ba   : > { %v477_v8 = vsub.f32 %v444_v45, %v469_v6  ;;  %501 = vadd.xlane.f32.xlu1 %v500_v7  ;;  %1130 = vpow2.f32 %v488_v5  ;;  %v1453_v45 = vstv %s1400_s17 }
 0x1bc   : > { %v1360_v9 = vpop.eup %1120  ;;  %v492_v10 = vmul.f32 1.442695, %v477_v8 }
 0x1bd   : > { %v494_v11 = vsel %vm445_vm0, %v1360_v9, 0.0  ;;  %v1364_v12 = vpop.eup %1122 }
 0x1be   : > { %495 = vadd.xlane.f32.xlu1 %v494_v11  ;;  %1132 = vpow2.f32 %v492_v10  ;;  %v506_v15 = vsel %vm445_vm0, %v1364_v12, 0.0 }
 0x1c0   : > { %v1366_v13 = vpop.eup %1124 }
 0x1c1   : > { %v1368_v14 = vpop.eup %1126  ;;  %v503_v16 = vsel %vm445_vm0, %v1366_v13, 0.0 }
 0x1c2   : > { %v1374_v17 = vpop.eup %1128  ;;  %507 = vadd.xlane.f32.xlu1 %v506_v15  ;;  %504 = vadd.xlane.f32.xlu0 %v503_v16  ;;  %v497_v19 = vsel %vm445_vm0, %v1368_v14, 0.0 }
 0x1c3   : > { %v512_v18 = vsel %vm445_vm0, %v1374_v17, 0.0 }
 0x1c4   : > { %v1380_v20 = vpop.eup %1130 }
 0x1c5   : > { %v509_v21 = vsel %vm445_vm0, %v1380_v20, 0.0 }
 0x1c6   : > { %513 = vadd.xlane.f32.xlu1 %v512_v18  ;;  %498 = vadd.xlane.f32.xlu0 %v497_v19 }
 0x1c8   : > { %v1384_v22 = vpop.eup %1132 }
 0x1c9   : > { %v515_v23 = vsel %vm445_vm0, %v1384_v22, 0.0 }
 0x1ca   : > { %510 = vadd.xlane.f32.xlu0 %v509_v21 }
 0x1ce   : > { %516 = vadd.xlane.f32.xlu0 %v515_v23 }
 0x247   : > { %v502_v24 = vpop.xlane.xlu1 %501 }
 0x248   : > { %1134 = vrcp.f32 %v502_v24 }
 0x24b   : > { %v496_v25 = vpop.xlane.xlu1 %495 }
 0x24c   : > { %1136 = vrcp.f32 %v496_v25 }
 0x24f   : > { %v508_v26 = vpop.xlane.xlu1 %507  ;;  %v505_v27 = vpop.xlane.xlu0 %504 }
 0x250   : > { %1138 = vrcp.f32 %v508_v26 }
 0x251   : > { %1140 = vrcp.f32 %v505_v27 }
 0x252   : > { %v1135_v28 = vpop.eup %1134 }
 0x253   : > { %v528_v35 = vmul.f32 %v1135_v28, %v1356_v4  ;;  %v514_v36 = vpop.xlane.xlu1 %513  ;;  %v499_v37 = vpop.xlane.xlu0 %498 }
 0x254   : > { %1142 = vrcp.f32 %v514_v36 }
 0x255   : > { %v539_v44 = vmax.f32 %v1420_v29, %v528_v35  ;;  %v876_v60 = vmul.f32 1e-09, %v528_v35  ;;  %1144 = vrcp.f32 %v499_v37 }
 0x256   : > { %v1137_v48 = vpop.eup %1136 }
 0x257   : > { %v548_v52 = vmin.f32 %v1422_v30, %v539_v44  ;;  %v511_v53 = vpop.xlane.xlu0 %510  ;;  %v526_v63 = vmul.f32 %v1137_v48, %v1360_v9 }
 0x258   : > { %1146 = vrcp.f32 %v511_v53 }
 0x259   : > { %v566_v58 = vsub.f32 %v548_v52, %v1420_v29  ;;  %v611_v59 = vsub.f32 %v548_v52, %v1428_v33  ;;  %v657_v61 = vsub.f32 %v548_v52, %v1437_v39  ;;  %v703_v62 = vsub.f32 %v548_v52, %v1446_v42 }
 0x25a   : > { %vm558_vm1 = vcmp.ge.f32.partialorder %v548_v52, %v1420_v29  ;;  %v749_v2 = vsub.f32 %v548_v52, %v1456_v46  ;;  %vm602_vm2 = vcmp.ge.f32.partialorder %v548_v52, %v1428_v33  ;;  %v795_v5 = vsub.f32 %v548_v52, %v1465_v50  ;;  %v1139_v6 = vpop.eup %1138 }
 0x25b   : > { %v576_v0 = vmul.f32 %v1426_v32, %v566_v58  ;;  %v621_v1 = vmul.f32 %v1434_v38, %v611_v59  ;;  %v667_v3 = vmul.f32 %v1440_v40, %v657_v61  ;;  %v713_v4 = vmul.f32 %v1453_v45, %v703_v62  ;;  %v1141_v15 = vpop.eup %1140 }
 0x25c   : > { %vm648_vm3 = vcmp.ge.f32.partialorder %v548_v52, %v1437_v39  ;;  %v759_v9 = vmul.f32 %v1459_v47, %v749_v2  ;;  %vm694_vm4 = vcmp.ge.f32.partialorder %v548_v52, %v1446_v42  ;;  %vm740_vm5 = vcmp.ge.f32.partialorder %v548_v52, %v1456_v46 }
 0x25d   : > { %v584_v7 = vadd.f32 %v576_v0, %v1424_v31  ;;  %v630_v8 = vadd.f32 %v1430_v34, %v621_v1  ;;  %v805_v10 = vmul.f32 %v1472_v54, %v795_v5  ;;  %v841_v11 = vsub.f32 %v548_v52, %v1475_v55 }
 0x25e   : > { %v676_v18 = vadd.f32 %v1443_v41, %v667_v3  ;;  %vm786_vm6 = vcmp.ge.f32.partialorder %v548_v52, %v1465_v50  ;;  %v537_v19 = vmax.f32 %v1420_v29, %v526_v63  ;;  %v1143_v21 = vpop.eup %1142  ;;  %v722_v24 = vadd.f32 %v1449_v43, %v713_v4 }
 0x25f   : > { %v592_v16 = vsel %vm558_vm1, %v584_v7, %v1424_v31  ;;  %v851_v25 = vmul.f32 %v1478_v56, %v841_v11  ;;  %v530_v26 = vmul.f32 %v1139_v6, %v1364_v12  ;;  %v768_v28 = vadd.f32 %v1462_v49, %v759_v9  ;;  %v1526_v53 = vpop.eup %1144 }
 0x260   : > { %v638_v23 = vsel %vm602_vm2, %v630_v8, %v592_v16  ;;  %vm832_vm7 = vcmp.ge.f32.partialorder %v548_v52, %v1475_v55  ;;  %v546_v35 = vmin.f32 %v1422_v30, %v537_v19  ;;  %v814_v37 = vadd.f32 %v1468_v51, %v805_v10 }
 0x261   : > { %v684_v27 = vsel %vm648_vm3, %v676_v18, %v638_v23  ;;  %v874_v44 = vmul.f32 1e-09, %v526_v63  ;;  %v1524_v48 = vmul.f32 %v1141_v15, %v1366_v13  ;;  %v860_v58 = vadd.f32 %v1481_v57, %v851_v25 }
 0x262   : > { %v730_v36 = vsel %vm694_vm4, %v722_v24, %v684_v27  ;;  %v564_v59 = vsub.f32 %v546_v35, %v1420_v29  ;;  %v1533_v61 = vmul.f32 %v1143_v21, %v1374_v17  ;;  %v1535_v62 = vpop.eup %1146  ;;  %v609_v13 = vsub.f32 %v546_v35, %v1428_v33 }
 0x263   : > { %v776_v12 = vsel %vm740_vm5, %v768_v28, %v730_v36  ;;  %v655_v0 = vsub.f32 %v546_v35, %v1437_v39  ;;  %v541_v1 = vmax.f32 %v1420_v29, %v530_v26  ;;  %v701_v4 = vsub.f32 %v546_v35, %v1446_v42 }
 0x264   : > { %v822_v63 = vsel %vm786_vm6, %v814_v37, %v776_v12  ;;  %v574_v3 = vmul.f32 %v1426_v32, %v564_v59  ;;  %v1546_v17 = vmul.f32 1e-09, %v530_v26  ;;  %vm556_vm8 = vcmp.ge.f32.partialorder %v546_v35, %v1420_v29 }
 0x265   : > { %v868_v2 = vsel %vm832_vm7, %v860_v58, %v822_v63  ;;  %v619_v6 = vmul.f32 %v1434_v38, %v609_v13  ;;  %v665_v7 = vmul.f32 %v1440_v40, %v655_v0  ;;  %vm600_vm9 = vcmp.ge.f32.partialorder %v546_v35, %v1428_v33 }
 0x266   : > { %v884_v5 = vadd.f32 %v876_v60, %v868_v2  ;;  %v582_v8 = vadd.f32 %v574_v3, %v1424_v31  ;;  %v711_v52 = vmul.f32 %v1453_v45, %v701_v4  ;;  %v747_v9 = vsub.f32 %v546_v35, %v1456_v46 }
 0x267   : > { %v628_v11 = vadd.f32 %v1430_v34, %v619_v6  ;;  %vm646_vm10 = vcmp.ge.f32.partialorder %v546_v35, %v1437_v39  ;;  %v793_v60 = vsub.f32 %v546_v35, %v1465_v50  ;;  %v674_v16 = vadd.f32 %v1443_v41, %v665_v7 }
 0x268   : > { %v892_v10 = vadd.f32 1.1754944e-38, %v884_v5  ;;  %v590_v15 = vsel %vm556_vm8, %v582_v8, %v1424_v31  ;;  %v720_v18 = vadd.f32 %v1449_v43, %v711_v52  ;;  %v757_v19 = vmul.f32 %v1459_v47, %v747_v9 }
 0x269   : > { %v636_v21 = vsel %vm600_vm9, %v628_v11, %v590_v15  ;;  %v803_v23 = vmul.f32 %v1472_v54, %v793_v60  ;;  %v839_v24 = vsub.f32 %v546_v35, %v1475_v55  ;;  %vm692_vm11 = vcmp.ge.f32.partialorder %v546_v35, %v1446_v42 }
 0x26a   : > { %1148 = vlog2.f32 %v892_v10  ;;  %v682_v25 = vsel %vm646_vm10, %v674_v16, %v636_v21  ;;  %v766_v26 = vadd.f32 %v1462_v49, %v757_v19  ;;  %v1567_v27 = vmin.f32 %v1422_v30, %v541_v1 }
 0x26b   : > { %v728_v28 = vsel %vm692_vm11, %v720_v18, %v682_v25  ;;  %vm738_vm12 = vcmp.ge.f32.partialorder %v546_v35, %v1456_v46  ;;  %v812_v36 = vadd.f32 %v1468_v51, %v803_v23  ;;  %v849_v37 = vmul.f32 %v1478_v56, %v839_v24 }
 0x26c   : > { %v774_v12 = vsel %vm738_vm12, %v766_v26, %v728_v28  ;;  %vm784_vm13 = vcmp.ge.f32.partialorder %v546_v35, %v1465_v50  ;;  %vm830_vm14 = vcmp.ge.f32.partialorder %v546_v35, %v1475_v55  ;;  %v568_v58 = vsub.f32 %v1567_v27, %v1420_v29 }
 0x26d   : > { %v820_v59 = vsel %vm784_vm13, %v812_v36, %v774_v12  ;;  %v858_v63 = vadd.f32 %v1481_v57, %v849_v37  ;;  %v613_v13 = vsub.f32 %v1567_v27, %v1428_v33  ;;  %v540_v0 = vmax.f32 %v1420_v29, %v1524_v48 }
 0x26e   : > { %vm560_vm15 = vcmp.ge.f32.partialorder %v1567_v27, %v1420_v29  ;;  %v578_v1 = vmul.f32 %v1426_v32, %v568_v58  ;;  %v659_v35 = vsub.f32 %v1567_v27, %v1437_v39  ;;  %v705_v2 = vsub.f32 %v1567_v27, %v1446_v42 }
 0x26f   : > { %v866_v3 = vsel %vm830_vm14, %v858_v63, %v820_v59  ;;  %vm604_vm1 = vcmp.ge.f32.partialorder %v1567_v27, %v1428_v33  ;;  %v623_v4 = vmul.f32 %v1434_v38, %v613_v13  ;;  %v751_v5 = vsub.f32 %v1567_v27, %v1456_v46 }
 0x270   : > { %v882_v6 = vadd.f32 %v874_v44, %v866_v3  ;;  %v586_v7 = vadd.f32 %v578_v1, %v1424_v31  ;;  %v669_v8 = vmul.f32 %v1440_v40, %v659_v35  ;;  %v715_v52 = vmul.f32 %v1453_v45, %v705_v2 }
 0x271   : > { %v632_v9 = vadd.f32 %v1430_v34, %v623_v4  ;;  %vm650_vm2 = vcmp.ge.f32.partialorder %v1567_v27, %v1437_v39  ;;  %v761_v10 = vmul.f32 %v1459_v47, %v751_v5  ;;  %v797_v11 = vsub.f32 %v1567_v27, %v1465_v50 }
 0x272   : > { %v890_v60 = vadd.f32 1.1754944e-38, %v882_v6  ;;  %v594_v44 = vsel %vm560_vm15, %v586_v7, %v1424_v31  ;;  %v678_v15 = vadd.f32 %v1443_v41, %v669_v8  ;;  %vm696_vm3 = vcmp.ge.f32.partialorder %v1567_v27, %v1446_v42 }
 0x273   : > { %v640_v18 = vsel %vm604_vm1, %v632_v9, %v594_v44  ;;  %v724_v19 = vadd.f32 %v1449_v43, %v715_v52  ;;  %v770_v21 = vadd.f32 %v1462_v49, %v761_v10  ;;  %v807_v23 = vmul.f32 %v1472_v54, %v797_v11 }
 0x274   : > { %v1149_v16 = vpop.eup %1148  ;;  %1150 = vlog2.f32 %v890_v60  ;;  %v686_v25 = vsel %vm650_vm2, %v678_v15, %v640_v18  ;;  %v843_v26 = vsub.f32 %v1567_v27, %v1475_v55  ;;  %vm742_vm4 = vcmp.ge.f32.partialorder %v1567_v27, %v1456_v46 }
 0x275   : > { %v903_v24 = vmul.f32 0.6931472, %v1149_v16  ;;  %v732_v28 = vsel %vm696_vm3, %v724_v19, %v686_v25  ;;  %v816_v36 = vadd.f32 %v1468_v51, %v807_v23  ;;  %v549_v37 = vmin.f32 %v1422_v30, %v540_v0 }
 0x276   : > { %v778_v12 = vsel %vm742_vm4, %v770_v21, %v732_v28  ;;  %vm788_vm5 = vcmp.ge.f32.partialorder %v1567_v27, %v1465_v50  ;;  %v853_v58 = vmul.f32 %v1478_v56, %v843_v26  ;;  %v877_v59 = vmul.f32 1e-09, %v1524_v48 }
 0x277   : > { %916 = vst.msk [vmem:[%s1614_s7 + $0x10] sm:$0xff] %vm445_vm0, %v903_v24  ;;  %v824_v63 = vsel %vm788_vm5, %v816_v36, %v778_v12  ;;  %vm834_vm6 = vcmp.ge.f32.partialorder %v1567_v27, %v1475_v55  ;;  %v567_v13 = vsub.f32 %v549_v37, %v1420_v29  ;;  %v543_v1 = vmax.f32 %v1420_v29, %v1533_v61 }
 0x278   : > { %v862_v0 = vadd.f32 %v1481_v57, %v853_v58  ;;  %v612_v35 = vsub.f32 %v549_v37, %v1428_v33  ;;  %v658_v2 = vsub.f32 %v549_v37, %v1437_v39  ;;  %v1644_v3 = vmul.f32 %v1526_v53, %v1368_v14 }
 0x279   : > { %vm559_vm7 = vcmp.ge.f32.partialorder %v549_v37, %v1420_v29  ;;  %v577_v48 = vmul.f32 %v1426_v32, %v567_v13  ;;  %vm603_vm8 = vcmp.ge.f32.partialorder %v549_v37, %v1428_v33  ;;  %v704_v27 = vsub.f32 %v549_v37, %v1446_v42 }
 0x27a   : > { %v870_v4 = vsel %vm834_vm6, %v862_v0, %v824_v63  ;;  %v622_v5 = vmul.f32 %v1434_v38, %v612_v35  ;;  %v668_v6 = vmul.f32 %v1440_v40, %v658_v2  ;;  %v750_v7 = vsub.f32 %v549_v37, %v1456_v46 }
 0x27b   : > { %v886_v8 = vadd.f32 %v1546_v17, %v870_v4  ;;  %v585_v14 = vadd.f32 %v577_v48, %v1424_v31  ;;  %vm649_vm9 = vcmp.ge.f32.partialorder %v549_v37, %v1437_v39  ;;  %v714_v53 = vmul.f32 %v1453_v45, %v704_v27 }
 0x27c   : > { %v631_v52 = vadd.f32 %v1430_v34, %v622_v5  ;;  %vm695_vm10 = vcmp.ge.f32.partialorder %v549_v37, %v1446_v42  ;;  %v760_v9 = vmul.f32 %v1459_v47, %v750_v7  ;;  %v796_v10 = vsub.f32 %v549_v37, %v1465_v50 }
 0x27d   : > { %v894_v11 = vadd.f32 1.1754944e-38, %v886_v8  ;;  %v593_v60 = vsel %vm559_vm7, %v585_v14, %v1424_v31  ;;  %v677_v17 = vadd.f32 %v1443_v41, %v668_v6  ;;  %v723_v44 = vadd.f32 %v1449_v43, %v714_v53 }
 0x27e   : > { %v1151_v15 = vpop.eup %1150  ;;  %v639_v16 = vsel %vm603_vm8, %v631_v52, %v593_v60  ;;  %v769_v18 = vadd.f32 %v1462_v49, %v760_v9  ;;  %v806_v19 = vmul.f32 %v1472_v54, %v796_v10  ;;  %v842_v21 = vsub.f32 %v549_v37, %v1475_v55 }
 0x27f   : > { %v899_v23 = vmul.f32 0.6931472, %v1151_v15  ;;  %1152 = vlog2.f32 %v894_v11  ;;  %v685_v24 = vsel %vm649_vm9, %v677_v17, %v639_v16  ;;  %v1674_v25 = vmin.f32 %v1422_v30, %v543_v1 }
 0x280   : > { %v731_v26 = vsel %vm695_vm10, %v723_v44, %v685_v24  ;;  %vm741_vm11 = vcmp.ge.f32.partialorder %v549_v37, %v1456_v46  ;;  %v815_v28 = vadd.f32 %v1468_v51, %v806_v19  ;;  %v852_v36 = vmul.f32 %v1478_v56, %v842_v21 }
 0x281   : > { %914 = vst.msk [vmem:[%s1614_s7] sm:$0xff] %vm445_vm0, %v899_v23  ;;  %v777_v12 = vsel %vm741_vm11, %v769_v18, %v731_v26  ;;  %vm787_vm12 = vcmp.ge.f32.partialorder %v549_v37, %v1465_v50  ;;  %vm833_vm13 = vcmp.ge.f32.partialorder %v549_v37, %v1475_v55  ;;  %v570_v58 = vsub.f32 %v1674_v25, %v1420_v29 }
 0x282   : > { %v823_v63 = vsel %vm787_vm12, %v815_v28, %v777_v12  ;;  %v861_v13 = vadd.f32 %v1481_v57, %v852_v36  ;;  %v615_v1 = vsub.f32 %v1674_v25, %v1428_v33  ;;  %v538_v0 = vmax.f32 %v1420_v29, %v1644_v3 }
 0x283   : > { %vm562_vm14 = vcmp.ge.f32.partialorder %v1674_v25, %v1420_v29  ;;  %v580_v35 = vmul.f32 %v1426_v32, %v570_v58  ;;  %v661_v37 = vsub.f32 %v1674_v25, %v1437_v39  ;;  %v707_v2 = vsub.f32 %v1674_v25, %v1446_v42 }
 0x284   : > { %v869_v48 = vsel %vm833_vm13, %v861_v13, %v823_v63  ;;  %vm606_vm15 = vcmp.ge.f32.partialorder %v1674_v25, %v1428_v33  ;;  %v625_v27 = vmul.f32 %v1434_v38, %v615_v1  ;;  %v753_v4 = vsub.f32 %v1674_v25, %v1456_v46 }
 0x285   : > { %v885_v5 = vadd.f32 %v877_v59, %v869_v48  ;;  %v588_v6 = vadd.f32 %v580_v35, %v1424_v31  ;;  %v671_v7 = vmul.f32 %v1440_v40, %v661_v37  ;;  %v717_v8 = vmul.f32 %v1453_v45, %v707_v2 }
 0x286   : > { %v634_v14 = vadd.f32 %v1430_v34, %v625_v27  ;;  %vm652_vm1 = vcmp.ge.f32.partialorder %v1674_v25, %v1437_v39  ;;  %v763_v53 = vmul.f32 %v1459_v47, %v753_v4  ;;  %v799_v52 = vsub.f32 %v1674_v25, %v1465_v50 }
 0x287   : > { %v893_v9 = vadd.f32 1.1754944e-38, %v885_v5  ;;  %v596_v59 = vsel %vm562_vm14, %v588_v6, %v1424_v31  ;;  %v680_v10 = vadd.f32 %v1443_v41, %v671_v7  ;;  %vm698_vm2 = vcmp.ge.f32.partialorder %v1674_v25, %v1446_v42 }
 0x288   : > { %v642_v11 = vsel %vm606_vm15, %v634_v14, %v596_v59  ;;  %v726_v60 = vadd.f32 %v1449_v43, %v717_v8  ;;  %v772_v17 = vadd.f32 %v1462_v49, %v763_v53  ;;  %v809_v44 = vmul.f32 %v1472_v54, %v799_v52 }
 0x289   : > { %v1153_v15 = vpop.eup %1152  ;;  %1154 = vlog2.f32 %v893_v9  ;;  %v688_v16 = vsel %vm652_vm1, %v680_v10, %v642_v11  ;;  %v845_v18 = vsub.f32 %v1674_v25, %v1475_v55  ;;  %v547_v19 = vmin.f32 %v1422_v30, %v538_v0 }
 0x28a   : > { %v907_v21 = vmul.f32 0.6931472, %v1153_v15  ;;  %v734_v23 = vsel %vm698_vm2, %v726_v60, %v688_v16  ;;  %vm744_vm3 = vcmp.ge.f32.partialorder %v1674_v25, %v1456_v46  ;;  %v818_v24 = vadd.f32 %v1468_v51, %v809_v44  ;;  %v517_v15 = vpop.xlane.xlu0 %516 }
 0x28b   : > { %v780_v26 = vsel %vm744_vm3, %v772_v17, %v734_v23  ;;  %vm790_vm4 = vcmp.ge.f32.partialorder %v1674_v25, %v1465_v50  ;;  %v855_v28 = vmul.f32 %v1478_v56, %v845_v18  ;;  %v565_v36 = vsub.f32 %v547_v19, %v1420_v29 }
 0x28c   : > { %918 = vst.msk [vmem:[%s1614_s7 + $0x20] sm:$0xff] %vm445_vm0, %v907_v21  ;;  %v826_v12 = vsel %vm790_vm4, %v818_v24, %v780_v26  ;;  %vm836_vm5 = vcmp.ge.f32.partialorder %v1674_v25, %v1475_v55  ;;  %v880_v58 = vmul.f32 1e-09, %v1533_v61  ;;  %v610_v63 = vsub.f32 %v547_v19, %v1428_v33 }
 0x28d   : > { %v864_v13 = vadd.f32 %v1481_v57, %v855_v28  ;;  %vm557_vm6 = vcmp.ge.f32.partialorder %v547_v19, %v1420_v29  ;;  %v575_v1 = vmul.f32 %v1426_v32, %v565_v36  ;;  %v656_v0 = vsub.f32 %v547_v19, %v1437_v39 }
 0x28e   : > { %vm601_vm7 = vcmp.ge.f32.partialorder %v547_v19, %v1428_v33  ;;  %v620_v35 = vmul.f32 %v1434_v38, %v610_v63  ;;  %v702_v37 = vsub.f32 %v547_v19, %v1446_v42  ;;  %v748_v25 = vsub.f32 %v547_v19, %v1456_v46 }
 0x28f   : > { %v872_v2 = vsel %vm836_vm5, %v864_v13, %v826_v12  ;;  %v583_v61 = vadd.f32 %v575_v1, %v1424_v31  ;;  %vm647_vm8 = vcmp.ge.f32.partialorder %v547_v19, %v1437_v39  ;;  %v666_v48 = vmul.f32 %v1440_v40, %v656_v0 }
 0x290   : > { %v888_v27 = vadd.f32 %v880_v58, %v872_v2  ;;  %v629_v4 = vadd.f32 %v1430_v34, %v620_v35  ;;  %v712_v5 = vmul.f32 %v1453_v45, %v702_v37  ;;  %v758_v6 = vmul.f32 %v1459_v47, %v748_v25 }
 0x291   : > { %v591_v7 = vsel %vm557_vm6, %v583_v61, %v1424_v31  ;;  %v675_v8 = vadd.f32 %v1443_v41, %v666_v48  ;;  %vm693_vm9 = vcmp.ge.f32.partialorder %v547_v19, %v1446_v42  ;;  %v794_v14 = vsub.f32 %v547_v19, %v1465_v50 }
 0x292   : > { %v896_v53 = vadd.f32 1.1754944e-38, %v888_v27  ;;  %v637_v52 = vsel %vm601_vm7, %v629_v4, %v591_v7  ;;  %v721_v9 = vadd.f32 %v1449_v43, %v712_v5  ;;  %v767_v59 = vadd.f32 %v1462_v49, %v758_v6 }
 0x293   : > { %v1155_v10 = vpop.eup %1154  ;;  %v683_v11 = vsel %vm647_vm8, %v675_v8, %v637_v52  ;;  %v804_v60 = vmul.f32 %v1472_v54, %v794_v14  ;;  %v840_v17 = vsub.f32 %v547_v19, %v1475_v55  ;;  %v531_v44 = vmul.f32 %v1535_v62, %v1380_v20 }
 0x294   : > { %v905_v16 = vmul.f32 0.6931472, %v1155_v10  ;;  %1156 = vlog2.f32 %v896_v53  ;;  %v729_v18 = vsel %vm693_vm9, %v721_v9, %v683_v11  ;;  %vm739_vm10 = vcmp.ge.f32.partialorder %v547_v19, %v1456_v46 }
 0x295   : > { %v775_v21 = vsel %vm739_vm10, %v767_v59, %v729_v18  ;;  %v813_v23 = vadd.f32 %v1468_v51, %v804_v60  ;;  %v850_v24 = vmul.f32 %v1478_v56, %v840_v17  ;;  %v542_v26 = vmax.f32 %v1420_v29, %v531_v44 }
 0x296   : > { %917 = vst.msk [vmem:[%s1614_s7 + $0x18] sm:$0xff] %vm445_vm0, %v905_v16  ;;  %vm785_vm11 = vcmp.ge.f32.partialorder %v547_v19, %v1465_v50  ;;  %1158 = vrcp.f32 %v517_v15  ;;  %vm831_vm12 = vcmp.ge.f32.partialorder %v547_v19, %v1475_v55  ;;  %v875_v36 = vmul.f32 1e-09, %v1644_v3 }
 0x297   : > { %v821_v28 = vsel %vm785_vm11, %v813_v23, %v775_v21  ;;  %v859_v20 = vadd.f32 %v1481_v57, %v850_v24  ;;  %v551_v62 = vmin.f32 %v1422_v30, %v542_v26  ;;  %v879_v26 = vmul.f32 1e-09, %v531_v44 }
 0x299   : > { %v867_v12 = vsel %vm831_vm12, %v859_v20, %v821_v28  ;;  %v569_v58 = vsub.f32 %v551_v62, %v1420_v29  ;;  %v614_v13 = vsub.f32 %v551_v62, %v1428_v33  ;;  %v660_v1 = vsub.f32 %v551_v62, %v1437_v39 }
 0x29a   : > { %v883_v63 = vadd.f32 %v875_v36, %v867_v12  ;;  %v706_v35 = vsub.f32 %v551_v62, %v1446_v42  ;;  %v752_v19 = vsub.f32 %v551_v62, %v1456_v46  ;;  %vm561_vm13 = vcmp.ge.f32.partialorder %v551_v62, %v1420_v29 }
 0x29b   : > { %v579_v0 = vmul.f32 %v1426_v32, %v569_v58  ;;  %v624_v25 = vmul.f32 %v1434_v38, %v614_v13  ;;  %v670_v2 = vmul.f32 %v1440_v40, %v660_v1  ;;  %v798_v48 = vsub.f32 %v551_v62, %v1465_v50 }
 0x29c   : > { %v891_v37 = vadd.f32 1.1754944e-38, %v883_v63  ;;  %v716_v61 = vmul.f32 %v1453_v45, %v706_v35  ;;  %vm605_vm14 = vcmp.ge.f32.partialorder %v551_v62, %v1428_v33  ;;  %v762_v5 = vmul.f32 %v1459_v47, %v752_v19 }
 0x29d   : > { %v587_v3 = vadd.f32 %v579_v0, %v1424_v31  ;;  %v633_v4 = vadd.f32 %v1430_v34, %v624_v25  ;;  %v679_v8 = vadd.f32 %v1443_v41, %v670_v2  ;;  %v808_v14 = vmul.f32 %v1472_v54, %v798_v48 }
 0x29e   : > { %v1157_v27 = vpop.eup %1156  ;;  %1160 = vlog2.f32 %v891_v37  ;;  %vm651_vm15 = vcmp.ge.f32.partialorder %v551_v62, %v1437_v39  ;;  %v725_v9 = vadd.f32 %v1449_v43, %v716_v61  ;;  %v844_v59 = vsub.f32 %v551_v62, %v1475_v55 }
 0x29f   : > { %v911_v6 = vmul.f32 0.6931472, %v1157_v27  ;;  %v595_v7 = vsel %vm561_vm13, %v587_v3, %v1424_v31  ;;  %vm697_vm1 = vcmp.ge.f32.partialorder %v551_v62, %v1446_v42  ;;  %v771_v11 = vadd.f32 %v1462_v49, %v762_v5 }
 0x2a0   : > { %v1159_v53 = vpop.eup %1158  ;;  %v641_v52 = vsel %vm605_vm14, %v633_v4, %v595_v7  ;;  %vm743_vm2 = vcmp.ge.f32.partialorder %v551_v62, %v1456_v46  ;;  %v817_v15 = vadd.f32 %v1468_v51, %v808_v14  ;;  %v854_v16 = vmul.f32 %v1478_v56, %v844_v59 }
 0x2a1   : > { %920 = vst.msk [vmem:[%s1614_s7 + $0x30] sm:$0xff] %vm445_vm0, %v911_v6  ;;  %v687_v10 = vsel %vm651_vm15, %v679_v8, %v641_v52  ;;  %v533_v60 = vmul.f32 %v1159_v53, %v1384_v22  ;;  %vm789_vm3 = vcmp.ge.f32.partialorder %v551_v62, %v1465_v50  ;;  %vm835_vm4 = vcmp.ge.f32.partialorder %v551_v62, %v1475_v55 }
 0x2a2   : > { %v733_v17 = vsel %vm697_vm1, %v725_v9, %v687_v10  ;;  %v863_v24 = vadd.f32 %v1481_v57, %v854_v16 }
 0x2a3   : > { %v779_v18 = vsel %vm743_vm2, %v771_v11, %v733_v17  ;;  %v544_v21 = vmax.f32 %v1420_v29, %v533_v60 }
 0x2a4   : > { %v825_v23 = vsel %vm789_vm3, %v817_v15, %v779_v18 }
 0x2a5   : > { %v553_v22 = vmin.f32 %v1422_v30, %v544_v21  ;;  %v871_v28 = vsel %vm835_vm4, %v863_v24, %v825_v23 }
 0x2a6   : > { %v887_v20 = vadd.f32 %v879_v26, %v871_v28 }
 0x2a7   : > { %v571_v36 = vsub.f32 %v553_v22, %v1420_v29  ;;  %v616_v58 = vsub.f32 %v553_v22, %v1428_v33  ;;  %v662_v63 = vsub.f32 %v553_v22, %v1437_v39  ;;  %v708_v35 = vsub.f32 %v553_v22, %v1446_v42 }
 0x2a8   : > { %v1161_v12 = vpop.eup %1160  ;;  %v895_v1 = vadd.f32 1.1754944e-38, %v887_v20  ;;  %v754_v30 = vsub.f32 %v553_v22, %v1456_v46  ;;  %vm563_vm5 = vcmp.ge.f32.partialorder %v553_v22, %v1420_v29  ;;  %v800_v19 = vsub.f32 %v553_v22, %v1465_v50 }
 0x2a9   : > { %v901_v13 = vmul.f32 0.6931472, %v1161_v12  ;;  %v581_v0 = vmul.f32 %v1426_v32, %v571_v36  ;;  %v626_v62 = vmul.f32 %v1434_v38, %v616_v58  ;;  %v672_v44 = vmul.f32 %v1440_v40, %v662_v63 }
 0x2aa   : > { %1162 = vlog2.f32 %v895_v1  ;;  %v718_v25 = vmul.f32 %v1453_v45, %v708_v35  ;;  %v764_v32 = vmul.f32 %v1459_v47, %v754_v30  ;;  %vm607_vm6 = vcmp.ge.f32.partialorder %v553_v22, %v1428_v33 }
 0x2ab   : > { %915 = vst.msk [vmem:[%s1614_s7 + $0x8] sm:$0xff] %vm445_vm0, %v901_v13  ;;  %v589_v37 = vadd.f32 %v581_v0, %v1424_v31  ;;  %v635_v2 = vadd.f32 %v1430_v34, %v626_v62  ;;  %v681_v40 = vadd.f32 %v1443_v41, %v672_v44  ;;  %v846_v3 = vsub.f32 %v553_v22, %v1475_v55 }
 0x2ac   : > { %vm653_vm7 = vcmp.ge.f32.partialorder %v553_v22, %v1437_v39  ;;  %v727_v45 = vadd.f32 %v1449_v43, %v718_v25  ;;  %v810_v29 = vmul.f32 %v1472_v54, %v800_v19  ;;  %vm699_vm8 = vcmp.ge.f32.partialorder %v553_v22, %v1446_v42 }
 0x2ad   : > { %v597_v38 = vsel %vm563_vm5, %v589_v37, %v1424_v31  ;;  %v773_v47 = vadd.f32 %v1462_v49, %v764_v32  ;;  %v856_v31 = vmul.f32 %v1478_v56, %v846_v3  ;;  %vm745_vm9 = vcmp.ge.f32.partialorder %v553_v22, %v1456_v46 }
 0x2ae   : > { %v643_v61 = vsel %vm607_vm6, %v635_v2, %v597_v38  ;;  %v819_v41 = vadd.f32 %v1468_v51, %v810_v29  ;;  %vm791_vm10 = vcmp.ge.f32.partialorder %v553_v22, %v1465_v50  ;;  %vm837_vm11 = vcmp.ge.f32.partialorder %v553_v22, %v1475_v55 }
 0x2af   : > { %v689_v34 = vsel %vm653_vm7, %v681_v40, %v643_v61  ;;  %v865_v39 = vadd.f32 %v1481_v57, %v856_v31  ;;  %v881_v42 = vmul.f32 1e-09, %v533_v60 }
 0x2b0   : > { %v735_v33 = vsel %vm699_vm8, %v727_v45, %v689_v34 }
 0x2b1   : > { %v781_v48 = vsel %vm745_vm9, %v773_v47, %v735_v33 }
 0x2b2   : > { %v827_v43 = vsel %vm791_vm10, %v819_v41, %v781_v48 }
 0x2b3   : > { %v873_v54 = vsel %vm837_vm11, %v865_v39, %v827_v43 }
 0x2b4   : > { %v889_v49 = vadd.f32 %v881_v42, %v873_v54  ;;  %v1163_v27 = vpop.eup %1162 }
 0x2b5   : > { %v909_v4 = vmul.f32 0.6931472, %v1163_v27 }
 0x2b6   : > { %v897_v56 = vadd.f32 1.1754944e-38, %v889_v49 }
 0x2b7   : > { %919 = vst.msk [vmem:[%s1614_s7 + $0x28] sm:$0xff] %vm445_vm0, %v909_v4 }
 0x2b8   : > { %1164 = vlog2.f32 %v897_v56 }
 0x2c2   : > { %v1165_v46 = vpop.eup %1164 }
 0x2c3   : > { %v913_v51 = vmul.f32 0.6931472, %v1165_v46 }
 0x2c5   : > { %921 = vst.msk [vmem:[%s1614_s7 + $0x38] sm:$0xff] %vm445_vm0, %v913_v51 }
 0x2c6 PF: > { %s18_s21 = sadd.s32 1, %s1225_s21  }
 0x2c7   : > { %p15_p9 = scmp.ge.s32.totalorder %s18_s21, 4  }
 0x2c9   :  { %17 = sbr.rel (!%p15_p9) target bundleno = 2 (0x2), region = 90 }
 0x2d0   :  { %944 = vsyncpa [#allocation3], 1 }
 0x2d1   :  { %946 = vsyncpa [#allocation3 + $0x1], 1 }
 0x2d2   :  { %947 = vsyncpa [#allocation5], 1 }

</bundles_post_ra>
